<compile_context>
chip_gen: v7x
topology: tpu7x:2x2x1
jax: 0.10.0
libtpu: 0.0.40
codegen_flags: <defaults>
</compile_context>

<pallas_src>
import functools

import jax
import jax.numpy as jnp
from jax.experimental import pallas as pl
from jax.experimental.pallas import tpu as pltpu

LN_EPS = 1e-12                      # BERT layernorm eps


def _vmem_limit_bytes():
    """Generation-aware scoped-VMEM budget: ~3/4 of physical, capped at 100 MiB.
    v5e/v6e (128 MiB physical) -> 96 MiB, v7x (64 MiB physical) -> 48 MiB."""
    phys = 64 * 1024 * 1024                     # conservative fallback (v7x-sized)
    try:
        info = pltpu.get_tpu_info()
        phys = int(getattr(info, "vmem_capacity_bytes", phys))
    except Exception:
        pass
    return int(min(phys * 3 // 4, 100 * 1024 * 1024))


VMEM_LIMIT = _vmem_limit_bytes()


# --------------------------------------------------------------------------------------
# Tiling helpers (never produce a tile of 1; full-extent blocks are always layout-legal).
# --------------------------------------------------------------------------------------
def _row_plan(M, cap):
    """Return (row_tile, padded_M).  Whole-M block if it fits the cap, else the largest
    multiple-of-8 divisor <= cap; else pad M up to a multiple of a multiple-of-8 tile."""
    if M <= cap:
        return M, M
    t = cap - cap % 8
    while t >= 8:
        if M % t == 0:
            return t, M
        t -= 8
    tm = cap - cap % 8
    return tm, ((M + tm - 1) // tm) * tm


def _col_tile(dim, cap):
    """Whole dim if it fits the cap, else the largest multiple-of-128 divisor, else the
    whole dim (a full-extent block is always legal)."""
    if dim <= cap:
        return dim
    t = cap - cap % 128
    while t >= 128:
        if dim % t == 0:
            return t
        t -= 128
    return dim


def _maybe_pad_rows(x, Mp):
    M = x.shape[0]
    if Mp == M:
        return x
    return jnp.pad(x, ((0, Mp - M), (0, 0)))


# --------------------------------------------------------------------------------------
# Linear: o = act(x @ w + b).
#   * K <= tk_cap: single-pass kernel, no K grid axis, no accumulator scratch.
#   * K  > tk_cap: K-axis reduction with an f32 VMEM accumulator (real-BERT FFN-2, K=3072).
# --------------------------------------------------------------------------------------
def _linear_single_kernel(x_ref, w_ref, b_ref, o_ref, *, activation):
    y = jnp.dot(x_ref[...], w_ref[...], preferred_element_type=jnp.float32) + b_ref[...]
    if activation == "gelu":
        y = jax.nn.gelu(y, approximate=False)          # exact erf GELU (matches BERT), f32
    elif activation == "tanh":
        y = jnp.tanh(y)
    o_ref[...] = y.astype(o_ref.dtype)


def _linear_acc_kernel(x_ref, w_ref, b_ref, o_ref, acc_ref, *, activation):
    @pl.when(pl.program_id(2) == 0)
    def _init():
        acc_ref[...] = jnp.zeros_like(acc_ref)

    acc_ref[...] += jnp.dot(x_ref[...], w_ref[...], preferred_element_type=jnp.float32)

    @pl.when(pl.program_id(2) == pl.num_programs(2) - 1)
    def _finalize():
        y = acc_ref[...] + b_ref[...]
        if activation == "gelu":
            y = jax.nn.gelu(y, approximate=False)
        elif activation == "tanh":
            y = jnp.tanh(y)
        o_ref[...] = y.astype(o_ref.dtype)


def linear(x, w, b, activation=None, tm_cap=512, tn_cap=768, tk_cap=1024):
    M, K = x.shape
    _, N = w.shape
    tm, Mp = _row_plan(M, tm_cap)
    tn = _col_tile(N, tn_cap)
    xp = _maybe_pad_rows(x, Mp)
    b2 = b.reshape(1, N).astype(jnp.float32)

    if K <= tk_cap:
        # TODO(synk): on v5e consider pipeline_mode=pl.Buffered(3) on the weight spec to
        # hide weight DMAs behind the slower MXU there.
        out = pl.pallas_call(
            functools.partial(_linear_single_kernel, activation=activation),
            out_shape=jax.ShapeDtypeStruct((Mp, N), x.dtype),
            grid=(Mp // tm, N // tn),
            in_specs=[
                pl.BlockSpec((tm, K), lambda i, j: (i, 0)),
                pl.BlockSpec((K, tn), lambda i, j: (0, j)),
                pl.BlockSpec((1, tn), lambda i, j: (0, j)),
            ],
            out_specs=pl.BlockSpec((tm, tn), lambda i, j: (i, j)),
            compiler_params=pltpu.CompilerParams(
                dimension_semantics=("parallel", "parallel"),
                vmem_limit_bytes=VMEM_LIMIT),
        )(xp, w, b2)
    else:
        tk = _col_tile(K, tk_cap)
        out = pl.pallas_call(
            functools.partial(_linear_acc_kernel, activation=activation),
            out_shape=jax.ShapeDtypeStruct((Mp, N), x.dtype),
            grid=(Mp // tm, N // tn, K // tk),
            in_specs=[
                pl.BlockSpec((tm, tk), lambda i, j, k: (i, k)),
                pl.BlockSpec((tk, tn), lambda i, j, k: (k, j)),
                pl.BlockSpec((1, tn), lambda i, j, k: (0, j)),
            ],
            out_specs=pl.BlockSpec((tm, tn), lambda i, j, k: (i, j)),
            scratch_shapes=[pltpu.VMEM((tm, tn), jnp.float32)],
            compiler_params=pltpu.CompilerParams(
                dimension_semantics=("parallel", "parallel", "arbitrary"),
                vmem_limit_bytes=VMEM_LIMIT),
        )(xp, w, b2)
    return out if Mp == M else out[:M]


# --------------------------------------------------------------------------------------
# Fused: o = LayerNorm(residual + x @ w + b).  N (= hidden) kept whole for the row stats.
# Single-pass when K fits; K-axis accumulator variant otherwise.
# --------------------------------------------------------------------------------------
def _lin_res_ln_single_kernel(x_ref, w_ref, b_ref, r_ref, g_ref, bt_ref, o_ref, *, eps):
    y = jnp.dot(x_ref[...], w_ref[...], preferred_element_type=jnp.float32)
    y = y + b_ref[...] + r_ref[...].astype(jnp.float32)
    mu = jnp.mean(y, axis=-1, keepdims=True)
    var = jnp.mean(jnp.square(y - mu), axis=-1, keepdims=True)
    y = (y - mu) * jax.lax.rsqrt(var + eps)
    o_ref[...] = (y * g_ref[...] + bt_ref[...]).astype(o_ref.dtype)


def _lin_res_ln_acc_kernel(x_ref, w_ref, b_ref, r_ref, g_ref, bt_ref, o_ref, acc_ref, *, eps):
    @pl.when(pl.program_id(1) == 0)
    def _init():
        acc_ref[...] = jnp.zeros_like(acc_ref)

    acc_ref[...] += jnp.dot(x_ref[...], w_ref[...], preferred_element_type=jnp.float32)

    @pl.when(pl.program_id(1) == pl.num_programs(1) - 1)
    def _finalize():
        y = acc_ref[...] + b_ref[...] + r_ref[...].astype(jnp.float32)
        mu = jnp.mean(y, axis=-1, keepdims=True)
        var = jnp.mean(jnp.square(y - mu), axis=-1, keepdims=True)
        y = (y - mu) * jax.lax.rsqrt(var + eps)
        o_ref[...] = (y * g_ref[...] + bt_ref[...]).astype(o_ref.dtype)


def linear_residual_layernorm(x, w, b, residual, gamma, beta, eps=LN_EPS,
                              tm_cap=512, tk_cap=1024):
    M, K = x.shape
    _, N = w.shape
    tm, Mp = _row_plan(M, tm_cap)
    xp = _maybe_pad_rows(x, Mp)
    rp = _maybe_pad_rows(residual, Mp)
    b2 = b.reshape(1, N).astype(jnp.float32)
    g2 = gamma.reshape(1, N).astype(jnp.float32)
    bt2 = beta.reshape(1, N).astype(jnp.float32)

    if K <= tk_cap:
        out = pl.pallas_call(
            functools.partial(_lin_res_ln_single_kernel, eps=eps),
            out_shape=jax.ShapeDtypeStruct((Mp, N), residual.dtype),
            grid=(Mp // tm,),
            in_specs=[
                pl.BlockSpec((tm, K), lambda i: (i, 0)),
                pl.BlockSpec((K, N), lambda i: (0, 0)),
                pl.BlockSpec((1, N), lambda i: (0, 0)),
                pl.BlockSpec((tm, N), lambda i: (i, 0)),
                pl.BlockSpec((1, N), lambda i: (0, 0)),
                pl.BlockSpec((1, N), lambda i: (0, 0)),
            ],
            out_specs=pl.BlockSpec((tm, N), lambda i: (i, 0)),
            compiler_params=pltpu.CompilerParams(
                dimension_semantics=("parallel",),
                vmem_limit_bytes=VMEM_LIMIT),
        )(xp, w, b2, rp, g2, bt2)
    else:
        tk = _col_tile(K, tk_cap)
        out = pl.pallas_call(
            functools.partial(_lin_res_ln_acc_kernel, eps=eps),
            out_shape=jax.ShapeDtypeStruct((Mp, N), residual.dtype),
            grid=(Mp // tm, K // tk),
            in_specs=[
                pl.BlockSpec((tm, tk), lambda i, k: (i, k)),
                pl.BlockSpec((tk, N), lambda i, k: (k, 0)),
                pl.BlockSpec((1, N), lambda i, k: (0, 0)),
                pl.BlockSpec((tm, N), lambda i, k: (i, 0)),
                pl.BlockSpec((1, N), lambda i, k: (0, 0)),
                pl.BlockSpec((1, N), lambda i, k: (0, 0)),
            ],
            out_specs=pl.BlockSpec((tm, N), lambda i, k: (i, 0)),
            scratch_shapes=[pltpu.VMEM((tm, N), jnp.float32)],
            compiler_params=pltpu.CompilerParams(
                dimension_semantics=("parallel", "arbitrary"),
                vmem_limit_bytes=VMEM_LIMIT),
        )(xp, w, b2, rp, g2, bt2)
    return out if Mp == M else out[:M]


# --------------------------------------------------------------------------------------
# Row-tiled layernorm (embedding LN); f32 stats, selectable output dtype.
# --------------------------------------------------------------------------------------
def _layernorm_kernel(x_ref, g_ref, b_ref, o_ref, *, eps):
    x = x_ref[...].astype(jnp.float32)
    mu = jnp.mean(x, axis=-1, keepdims=True)
    var = jnp.mean(jnp.square(x - mu), axis=-1, keepdims=True)
    y = (x - mu) * jax.lax.rsqrt(var + eps)
    o_ref[...] = (y * g_ref[...] + b_ref[...]).astype(o_ref.dtype)


def layernorm(x, gamma, beta, eps=LN_EPS, tm_cap=512, out_dtype=None):
    M, H = x.shape
    if out_dtype is None:
        out_dtype = x.dtype
    tm, Mp = _row_plan(M, tm_cap)
    xp = _maybe_pad_rows(x, Mp)
    out = pl.pallas_call(
        functools.partial(_layernorm_kernel, eps=eps),
        out_shape=jax.ShapeDtypeStruct((Mp, H), out_dtype),
        grid=(Mp // tm,),
        in_specs=[
            pl.BlockSpec((tm, H), lambda i: (i, 0)),
            pl.BlockSpec((1, H), lambda i: (0, 0)),
            pl.BlockSpec((1, H), lambda i: (0, 0)),
        ],
        out_specs=pl.BlockSpec((tm, H), lambda i: (i, 0)),
        compiler_params=pltpu.CompilerParams(
            dimension_semantics=("parallel",),
            vmem_limit_bytes=VMEM_LIMIT),
    )(xp, gamma.reshape(1, H).astype(jnp.float32), beta.reshape(1, H).astype(jnp.float32))
    return out if Mp == M else out[:M]


# --------------------------------------------------------------------------------------
# Attention over the fused (B*S, 3H) QKV slab.
#   grid = (batch, head_group, q_tile) with the q-tile axis innermost so K/V group blocks
#   stay VMEM-resident.  Heads are packed into groups of >= 128 output lanes (2 heads for
#   head_dim=64) so the context HBM store is lane-dense; the head-concat context is written
#   straight into a (B*S, H) slab -> no split_heads/merge transposes through HBM.
# --------------------------------------------------------------------------------------
def _attn_kernel(q_ref, k_ref, v_ref, m_ref, o_ref, *, scale, heads, head_dim):
    mask = m_ref[0]                                       # (1, S) additive mask, f32
    ctxs = []
    for h in range(heads):                                # static unroll over packed heads
        lo = h * head_dim
        q = q_ref[:, lo:lo + head_dim]
        k = k_ref[:, lo:lo + head_dim]
        v = v_ref[:, lo:lo + head_dim]
        # QK^T without materializing a transpose: contract the last dims.
        s = jax.lax.dot_general(q, k, (((1,), (1,)), ((), ())),
                                preferred_element_type=jnp.float32) * scale
        s = s + mask
        s = s - jnp.max(s, axis=-1, keepdims=True)
        p = jnp.exp(s)
        p = p * pl.reciprocal(jnp.sum(p, axis=-1, keepdims=True), approx=True)
        ctxs.append(jnp.dot(p.astype(v.dtype), v, preferred_element_type=jnp.float32))
    # TODO(synk): batch the per-head matmuls (leading-batch dot_general) to fill the MXU
    # fully when head_dim < 128; the concat already makes the HBM store lane-dense.
    ctx = ctxs[0] if heads == 1 else jnp.concatenate(ctxs, axis=-1)
    o_ref[...] = ctx.astype(o_ref.dtype)


def _heads_per_group(n_heads, head_dim):
    if head_dim >= 128:
        return 1
    for g in range(1, n_heads + 1):
        if n_heads % g == 0 and g * head_dim >= 128:
            return g
    return n_heads


def attention(qkv, mask_add, B, S, n_heads, head_dim, out_dtype, tq_cap=256):
    H = n_heads * head_dim
    G = _heads_per_group(n_heads, head_dim)
    n_groups = n_heads // G
    gw = G * head_dim                         # lane width of one head group
    tq, Sp = _row_plan(S, tq_cap)
    if Sp != S:                               # never pad the sequence; fall back to whole S
        tq = S
    nq = S // tq
    scale = 1.0 / (head_dim ** 0.5)

    return pl.pallas_call(
        functools.partial(_attn_kernel, scale=scale, heads=G, head_dim=head_dim),
        out_shape=jax.ShapeDtypeStruct((B * S, H), out_dtype),
        grid=(B, n_groups, nq),               # qi innermost: K/V group stays VMEM-resident
        in_specs=[
            pl.BlockSpec((tq, gw), lambda b, g, qi: (b * nq + qi, g)),           # Q rows
            pl.BlockSpec((S, gw), lambda b, g, qi: (b, n_groups + g)),           # K (full S)
            pl.BlockSpec((S, gw), lambda b, g, qi: (b, 2 * n_groups + g)),       # V (full S)
            pl.BlockSpec((1, 1, S), lambda b, g, qi: (b, 0, 0)),                 # mask
        ],
        out_specs=pl.BlockSpec((tq, gw), lambda b, g, qi: (b * nq + qi, g)),
        compiler_params=pltpu.CompilerParams(
            dimension_semantics=("parallel", "parallel", "parallel"),
            vmem_limit_bytes=VMEM_LIMIT),
    )(qkv, qkv, qkv, mask_add)


# --------------------------------------------------------------------------------------
# Fused pooler + classifier: tanh(cls @ Wp + bp) @ Wc + bc.
# Pooler weight stays bf16 (f32 accumulation only); classifier weight padded to 128 output
# lanes for a lane-dense store, sliced to (B, 1) outside.
# --------------------------------------------------------------------------------------
def _pool_cls_kernel(x_ref, wp_ref, bp_ref, wc_ref, bc_ref, o_ref):
    pooled = jnp.tanh(jnp.dot(x_ref[...], wp_ref[...], preferred_element_type=jnp.float32)
                      + bp_ref[...])
    # dropout(p=0.1) is identity at inference.
    logits = jnp.dot(pooled, wc_ref[...], preferred_element_type=jnp.float32) + bc_ref[...]
    o_ref[...] = logits.astype(o_ref.dtype)


def pool_and_classify(cls_tok, wp, bp, wc, bc):
    B, H = cls_tok.shape
    PAD = 128
    wc_pad = jnp.zeros((H, PAD), jnp.float32).at[:, :1].set(wc.astype(jnp.float32))
    bc_pad = jnp.zeros((1, PAD), jnp.float32).at[:, :1].set(bc.reshape(1, 1).astype(jnp.float32))
    out = pl.pallas_call(
        _pool_cls_kernel,
        out_shape=jax.ShapeDtypeStruct((B, PAD), jnp.float32),
        grid=(1,),
        in_specs=[
            pl.BlockSpec((B, H), lambda i: (0, 0)),
            pl.BlockSpec((H, H), lambda i: (0, 0)),
            pl.BlockSpec((1, H), lambda i: (0, 0)),
            pl.BlockSpec((H, PAD), lambda i: (0, 0)),
            pl.BlockSpec((1, PAD), lambda i: (0, 0)),
        ],
        out_specs=pl.BlockSpec((B, PAD), lambda i: (0, 0)),
        compiler_params=pltpu.CompilerParams(vmem_limit_bytes=VMEM_LIMIT),
    )(cls_tok, wp, bp.reshape(1, H).astype(jnp.float32), wc_pad, bc_pad)
    return out[:, :1]                                     # (B, 1) logits


# --------------------------------------------------------------------------------------
# Model glue (plain JAX): embeddings, parameter init, layer stacking.
# --------------------------------------------------------------------------------------
def init_params(key, vocab, type_vocab, max_pos, H, n_layers, n_heads, ffn):
    scale = 0.02
    keys = iter(jax.random.split(key, 8 + 8 * n_layers))

    def nrm(shape, dtype=jnp.bfloat16):
        return (scale * jax.random.normal(next(keys), shape, dtype=jnp.float32)).astype(dtype)

    params = {
        "tok_emb": nrm((vocab, H)),
        "pos_emb": nrm((max_pos, H)),
        "type_emb": nrm((type_vocab, H)),
        "emb_ln_g": jnp.ones((H,), jnp.float32),
        "emb_ln_b": jnp.zeros((H,), jnp.float32),
        "pool_w": nrm((H, H)),                            # bf16: MXU-rate operand
        "pool_b": jnp.zeros((H,), jnp.float32),
        "cls_w": nrm((H, 1), jnp.float32),                # nn.Linear(hidden_size, 1)
        "cls_b": jnp.zeros((1,), jnp.float32),
        "layers": [],
    }
    for _ in range(n_layers):
        wq, wk, wv = nrm((H, H)), nrm((H, H)), nrm((H, H))
        params["layers"].append({
            "wqkv": jnp.concatenate([wq, wk, wv], axis=1),   # fused QKV weight (H, 3H)
            "bqkv": jnp.zeros((3 * H,), jnp.float32),
            "wo": nrm((H, H)), "bo": jnp.zeros((H,), jnp.float32),
            "ln1_g": jnp.ones((H,), jnp.float32), "ln1_b": jnp.zeros((H,), jnp.float32),
            "w1": nrm((H, ffn)), "b1": jnp.zeros((ffn,), jnp.float32),
            "w2": nrm((ffn, H)), "b2": jnp.zeros((H,), jnp.float32),
            "ln2_g": jnp.ones((H,), jnp.float32), "ln2_b": jnp.zeros((H,), jnp.float32),
        })
    return params


def encoder_layer(x, p, B, S, n_heads, mask_add):
    H = x.shape[-1]
    Dh = H // n_heads
    # Kernel-boundary note: at real BERT shapes the per-op split is the right granularity;
    # for tiny batch*seq the (B*S,3H) slab round-trip could be fused into the QKV finalize.
    qkv = linear(x, p["wqkv"], p["bqkv"])                                # (B*S, 3H), one matmul
    ctx = attention(qkv, mask_add, B, S, n_heads, Dh, x.dtype)           # (B*S, H) head-concat
    x = linear_residual_layernorm(ctx, p["wo"], p["bo"], x, p["ln1_g"], p["ln1_b"])
    ff = linear(x, p["w1"], p["b1"], activation="gelu")                  # bias + exact GELU fused
    x = linear_residual_layernorm(ff, p["w2"], p["b2"], x, p["ln2_g"], p["ln2_b"])
    return x


def pair_clr_base_forward(params, input_ids, attn_masks, token_type_ids, n_heads):
    """Mirrors PairClrBaseModel.forward (albert/bert branch): returns logits of shape (B, 1)."""
    B, S = input_ids.shape
    H = params["tok_emb"].shape[1]

    pos_ids = jnp.arange(S)
    # embedding sum in f32 (matches PyTorch BERT); encoder stack runs in bf16
    x = (params["tok_emb"][input_ids].astype(jnp.float32)
         + params["pos_emb"][pos_ids][None, :, :].astype(jnp.float32)
         + params["type_emb"][token_type_ids].astype(jnp.float32))
    x = layernorm(x.reshape(B * S, H), params["emb_ln_g"], params["emb_ln_b"],
                  out_dtype=jnp.bfloat16)

    # additive attention mask kept in f32 so fully-masked columns stay finite before exp
    mask_add = ((1.0 - attn_masks.astype(jnp.float32)) * -1e9).reshape(B, 1, S)

    for layer_params in params["layers"]:
        x = encoder_layer(x, layer_params, B, S, n_heads, mask_add)

    cls_tok = x.reshape(B, S, H)[:, 0, :]                                # pooler input = [CLS]
    logits = pool_and_classify(cls_tok, params["pool_w"], params["pool_b"],
                               params["cls_w"], params["cls_b"])         # (B, 1) f32
    return logits


# --------------------------------------------------------------------------------------
if __name__ == "__main__":
    # Small, BERT-shaped configuration.  head_dim = 64 (like real BERT) so the run exercises
    # the 2-heads-per-block lane-dense attention path.
    B, S, H = 2, 8, 256
    N_LAYERS, N_HEADS, FFN = 2, 4, 512
    VOCAB, TYPE_VOCAB, MAX_POS = 128, 2, 16

    root = jax.random.PRNGKey(0)
    k_params, k_ids = jax.random.split(root)

    params = init_params(k_params, VOCAB, TYPE_VOCAB, MAX_POS, H, N_LAYERS, N_HEADS, FFN)

    input_ids = jax.random.randint(k_ids, (B, S), 0, VOCAB, dtype=jnp.int32)
    attn_masks = jnp.ones((B, S), jnp.int32).at[:, 6:].set(0)            # last 2 tokens padded
    token_type_ids = jnp.concatenate(
        [jnp.zeros((B, S // 2), jnp.int32), jnp.ones((B, S // 2), jnp.int32)], axis=1)

    logits = pair_clr_base_forward(params, input_ids, attn_masks, token_type_ids, N_HEADS)
    logits = jax.block_until_ready(logits)
    assert logits.shape == (B, 1) and logits.dtype == jnp.float32
    assert bool(jnp.all(jnp.isfinite(logits)))
    print("KERNEL_OK")
</pallas_src>

<mosaic_0001>
module attributes {stable_mosaic.version = 11 : i64} {
  func.func @_layernorm_kernel(%arg0: i32, %arg1: memref<16x256xf32, #tpu.memory_space<vmem>>, %arg2: memref<1x256xf32, #tpu.memory_space<vmem>>, %arg3: memref<1x256xf32, #tpu.memory_space<vmem>>, %arg4: memref<16x256xbf16, #tpu.memory_space<vmem>>) attributes {dimension_semantics = [#tpu.dimension_semantics<parallel>], iteration_bounds = array<i64: 1>, scalar_prefetch = 0 : i64, scratch_operands = 0 : i64, tpu.core_type = #tpu.core_type<tc>, window_params = [{transform_indices = @transform_0, window_bounds = array<i64: 16, 256>}, {pipeline_mode = #tpu.pipeline_mode<synchronous>, transform_indices = @transform_1, window_bounds = array<i64: 1, 256>}, {pipeline_mode = #tpu.pipeline_mode<synchronous>, transform_indices = @transform_2, window_bounds = array<i64: 1, 256>}, {transform_indices = @transform_3, window_bounds = array<i64: 16, 256>}]} {
    %c0 = arith.constant 0 : index
    %c0_0 = arith.constant 0 : index
    %0 = vector.load %arg1[%c0, %c0_0] : memref<16x256xf32, #tpu.memory_space<vmem>>, vector<16x256xf32>
    %cst = arith.constant dense<0.000000e+00> : vector<16xf32>
    %1 = vector.multi_reduction <add>, %0, %cst [1] : vector<16x256xf32> to vector<16xf32>
    %2 = vector.shape_cast %1 : vector<16xf32> to vector<16x1xf32>
    %cst_1 = arith.constant 2.560000e+02 : f32
    %3 = vector.broadcast %cst_1 : f32 to vector<16x1xf32>
    %4 = arith.divf %2, %3 : vector<16x1xf32>
    %5 = vector.broadcast %4 : vector<16x1xf32> to vector<16x256xf32>
    %6 = arith.subf %0, %5 : vector<16x256xf32>
    %7 = arith.mulf %6, %6 : vector<16x256xf32>
    %cst_2 = arith.constant dense<0.000000e+00> : vector<16xf32>
    %8 = vector.multi_reduction <add>, %7, %cst_2 [1] : vector<16x256xf32> to vector<16xf32>
    %9 = vector.shape_cast %8 : vector<16xf32> to vector<16x1xf32>
    %cst_3 = arith.constant 2.560000e+02 : f32
    %10 = vector.broadcast %cst_3 : f32 to vector<16x1xf32>
    %11 = arith.divf %9, %10 : vector<16x1xf32>
    %12 = vector.broadcast %4 : vector<16x1xf32> to vector<16x256xf32>
    %13 = arith.subf %0, %12 : vector<16x256xf32>
    %cst_4 = arith.constant 9.99999996E-13 : f32
    %14 = vector.broadcast %cst_4 : f32 to vector<16x1xf32>
    %15 = arith.addf %11, %14 : vector<16x1xf32>
    %16 = math.rsqrt %15 : vector<16x1xf32>
    %17 = vector.broadcast %16 : vector<16x1xf32> to vector<16x256xf32>
    %18 = arith.mulf %13, %17 : vector<16x256xf32>
    %c0_5 = arith.constant 0 : index
    %c0_6 = arith.constant 0 : index
    %19 = vector.load %arg2[%c0_5, %c0_6] : memref<1x256xf32, #tpu.memory_space<vmem>>, vector<1x256xf32>
    %20 = vector.broadcast %19 : vector<1x256xf32> to vector<16x256xf32>
    %21 = arith.mulf %18, %20 : vector<16x256xf32>
    %c0_7 = arith.constant 0 : index
    %c0_8 = arith.constant 0 : index
    %22 = vector.load %arg3[%c0_7, %c0_8] : memref<1x256xf32, #tpu.memory_space<vmem>>, vector<1x256xf32>
    %23 = vector.broadcast %22 : vector<1x256xf32> to vector<16x256xf32>
    %24 = arith.addf %21, %23 : vector<16x256xf32>
    %25 = arith.truncf %24 : vector<16x256xf32> to vector<16x256xbf16>
    %c0_9 = arith.constant 0 : index
    %c0_10 = arith.constant 0 : index
    %26 = vector.load %arg4[%c0_9, %c0_10] : memref<16x256xbf16, #tpu.memory_space<vmem>>, vector<16x256xbf16>
    tpu.vector_store %arg4[%c0_9, %c0_10], %25 {strides = array<i32>} : memref<16x256xbf16, #tpu.memory_space<vmem>>, vector<16x256xbf16>,
    return
  }
  func.func @transform_0(%arg0: i32) -> (i32, i32) {
    %c0_i32 = arith.constant 0 : i32
    %c0_i32_0 = arith.constant 0 : i32
    return %arg0, %c0_i32 : i32, i32
  }
  func.func @transform_1(%arg0: i32) -> (i32, i32) {
    %c0_i32 = arith.constant 0 : i32
    %c0_i32_0 = arith.constant 0 : i32
    %c0_i32_1 = arith.constant 0 : i32
    return %c0_i32, %c0_i32_0 : i32, i32
  }
  func.func @transform_2(%arg0: i32) -> (i32, i32) {
    %c0_i32 = arith.constant 0 : i32
    %c0_i32_0 = arith.constant 0 : i32
    %c0_i32_1 = arith.constant 0 : i32
    return %c0_i32, %c0_i32_0 : i32, i32
  }
  func.func @transform_3(%arg0: i32) -> (i32, i32) {
    %c0_i32 = arith.constant 0 : i32
    %c0_i32_0 = arith.constant 0 : i32
    return %arg0, %c0_i32 : i32, i32
  }
}

</mosaic_0001>

<bundles_post_ra>
// kernel: tpu_custom_call.1
= control target key start
LH: loop header
LB: loop body
LE: loop exit
PB: predicated region body
PF: predicated region fallthrough
CT: control target
= control target key end

     0   :  { %8 = vsyncpa [#allocation3], 0  ;;  %s247_s0 = inlined_call_operand.hbm [shape: f32[16,256], index: 0, kind: input, shape index: {}]   ;;  %s248_s1 = inlined_call_operand.vmem [shape: f32[1,256], index: 1, kind: input, shape index: {}]   ;;  %s249_s2 = inlined_call_operand.vmem [shape: f32[1,256], index: 2, kind: input, shape index: {}]   ;;  %s250_s3 = inlined_call_operand.hbm [shape: bf16[16,256], index: 3, kind: output, shape index: {}]  }
   0x1   :  { %9 = vsyncpa [#allocation4], 0  ;;  %s191_s12 = smov [#allocation2]   ;;  %s143_s16 = scalar_lea.hbm %s247_s0, 512 }
   0x2   :  { %s15_s13 = sshll.u32 %s191_s12, 4  ;;  %p144_p0 = scmp.ne.s32.totalorder %s247_s0, %s143_s16  ;;  %s16_s13 = int_to_ptr.vmem [resolvable:$true] %s15_s13 }
   0x3   :  { %p147_p1 = scmp.lt.u32.totalorder %s143_s16, %s247_s0 }
   0x5   :  { %p149_p2 = pnand %p147_p1, %p144_p0 }
   0x7   :  { %152 = shalt.err (!%p149_p2)
}
   0x8   :  { %s153_s21 = scalar_lea.vmem %s16_s13, 512  ;;  %p158_p4 = scmp.lt.s32.totalorder %s16_s13, %s16_s13 }
   0x9   :  { %p154_p3 = scmp.ne.s32.totalorder %s16_s13, %s153_s21  ;;  %p159_p5 = scmp.lt.s32.totalorder %s153_s21, %s153_s21 }
   0xb   :  { %p160_p6 = por %p159_p5, %p158_p4 }
   0xd   :  { %p161_p7 = pnand %p160_p6, %p154_p3 }
   0xf   :  { %164 = shalt.err (!%p161_p7)
}
  0x10   :  { %s192_s22 = smov 256   ;;  %s193_s23 = smov 16  }
  0x11   :  { %21 = dma.hbm_to_vmem [thread:$0]  %s247_s0, 512, %s16_s13, [#allocation3], %s192_s22, %s192_s22, %s193_s23  }
  0x12   :  { %187 = dma.done.wait [#allocation3], 512  }
  0x13   :  { %188 = vsyncadd [#allocation3], 4294966784  ;;  %v29_v0 = vld [vmem:[#allocation2] sm:$0xff]  ;;  %v30_v1 = vld [vmem:[#allocation2 + $0x8] sm:$0xff]  ;;  %v68_v22 = vlaneseq }
  0x14   :  { %v31_v2 = vld [vmem:[#allocation2 + $0x10] sm:$0xff]  ;;  %v33_v3 = vadd.f32 %v30_v1, %v29_v0  ;;  %v32_v4 = vld [vmem:[#allocation2 + $0x18] sm:$0xff]  ;;  %v66_v30 = vld [vmem:[%s248_s1] sm:$0x3]  ;;  %s194_s1 = smov [#allocation5]  }
  0x15   :  { %v36_v5 = vadd.f32 %v32_v4, %v31_v2  ;;  %v69_v26 = vshrl.u32 %v68_v22, 7  ;;  %v82_v31 = vld [vmem:[%s249_s2] sm:$0x3]  ;;  %s117_s29 = sshll.u32 %s194_s1, 4  ;;  %s118_s29 = int_to_ptr.vmem [resolvable:$true] %s117_s29 }
  0x16   :  { %34 = vadd.xlane.f32.xlu0 %v33_v3  ;;  %s165_s2 = scalar_lea.vmem %s118_s29, 256  ;;  %p170_p9 = scmp.lt.s32.totalorder %s118_s29, %s118_s29 }
  0x17   :  { %v70_v28 = vsub.s32 0, %v69_v26  ;;  %v74_v29 = vsub.s32 1, %v69_v26  ;;  %p166_p8 = scmp.ne.s32.totalorder %s118_s29, %s165_s2  ;;  %p171_p10 = scmp.lt.s32.totalorder %s165_s2, %s165_s2 }
  0x19   :  { %v71_v32 = vrot.slane %v66_v30, %v70_v28  ;;  %v75_v33 = vrot.slane %v66_v30, %v74_v29  ;;  %v87_v37 = vrot.slane %v82_v31, %v70_v28  ;;  %v91_v38 = vrot.slane %v82_v31, %v74_v29  ;;  %p172_p11 = por %p171_p10, %p170_p9 }
  0x1a   :  { %37 = vadd.xlane.f32.xlu0 %v36_v5 }
  0x1b   :  { %p173_p12 = pnand %p172_p11, %p166_p8 }
  0xa3   :  { %v35_v6 = vpop.xlane.xlu0 %34 }
  0xa4   :  { %v40_v7 = vmul.f32 0.00390625, %v35_v6 }
  0xa6   :  { %v42_v8 = vsub.f32 %v29_v0, %v40_v7  ;;  %v43_v9 = vsub.f32 %v30_v1, %v40_v7 }
  0xa7   :  { %v38_v10 = vpop.xlane.xlu0 %37 }
  0xa8   :  { %v41_v11 = vmul.f32 0.00390625, %v38_v10  ;;  %v46_v12 = vmul.f32 %v42_v8, %v42_v8  ;;  %v47_v13 = vmul.f32 %v43_v9, %v43_v9 }
  0xaa   :  { %v44_v14 = vsub.f32 %v31_v2, %v41_v11  ;;  %v45_v15 = vsub.f32 %v32_v4, %v41_v11  ;;  %v50_v16 = vadd.f32 %v47_v13, %v46_v12 }
  0xac   :  { %51 = vadd.xlane.f32.xlu1 %v50_v16  ;;  %v48_v17 = vmul.f32 %v44_v14, %v44_v14  ;;  %v49_v18 = vmul.f32 %v45_v15, %v45_v15 }
  0xae   :  { %v53_v19 = vadd.f32 %v49_v18, %v48_v17 }
  0xb0   :  { %54 = vadd.xlane.f32.xlu1 %v53_v19 }
 0x139   :  { %v52_v20 = vpop.xlane.xlu1 %51 }
 0x13a   :  { %v56_v21 = vmul.f32 0.00390625, %v52_v20 }
 0x13c   :  { %v58_v23 = vadd.f32 1e-12, %v56_v21 }
 0x13d   :  { %v55_v24 = vpop.xlane.xlu1 %54 }
 0x13e   :  { %139 = vrsqrt.f32 %v58_v23  ;;  %v57_v25 = vmul.f32 0.00390625, %v55_v24 }
 0x140   :  { %v59_v27 = vadd.f32 1e-12, %v57_v25 }
 0x142   :  { %141 = vrsqrt.f32 %v59_v27 }
 0x148   :  { %v140_v34 = vpop.eup %139 }
 0x149   :  { %v62_v35 = vmul.f32 %v140_v34, %v42_v8  ;;  %v63_v36 = vmul.f32 %v140_v34, %v43_v9 }
 0x14b   :  { %v78_v39 = vmul.f32 %v71_v32, %v62_v35  ;;  %v79_v40 = vmul.f32 %v75_v33, %v63_v36 }
 0x14c   :  { %v142_v41 = vpop.eup %141 }
 0x14d   :  { %v64_v42 = vmul.f32 %v142_v41, %v44_v14  ;;  %v65_v43 = vmul.f32 %v142_v41, %v45_v15  ;;  %v94_v44 = vadd.f32 %v87_v37, %v78_v39  ;;  %v95_v45 = vadd.f32 %v91_v38, %v79_v40 }
 0x14f   :  { %v80_v46 = vmul.f32 %v71_v32, %v64_v42  ;;  %v81_v47 = vmul.f32 %v75_v33, %v65_v43  ;;  %v131_v48 = vpack.c.bf16 %v95_v45, %v94_v44 }
 0x151   :  { %v96_v49 = vadd.f32 %v87_v37, %v80_v46  ;;  %v97_v50 = vadd.f32 %v91_v38, %v81_v47  ;;  %110 = vst [vmem:[#allocation5] sm:$0xff] %v131_v48 }
 0x153   :  { %v132_v51 = vpack.c.bf16 %v97_v50, %v96_v49 }
 0x155   :  { %111 = vst [vmem:[#allocation5 + $0x8] sm:$0xff] %v132_v51 }
 0x156   :  { %176 = shalt.err (!%p173_p12)
}
 0x157   :  { %s177_s5 = scalar_lea.hbm %s250_s3, 256 }
 0x158   :  { %p178_p13 = scmp.ne.s32.totalorder %s250_s3, %s177_s5  ;;  %p181_p0 = scmp.lt.u32.totalorder %s177_s5, %s250_s3 }
 0x15a   :  { %p183_p1 = pnand %p181_p0, %p178_p13 }
 0x15c   :  { %186 = shalt.err (!%p183_p1)
}
 0x15d   :  { %s195_s10 = smov 128   ;;  %s196_s11 = smov 8  }
 0x15e   :  { %123 = dma.vmem_to_hbm [thread:$0]  %s118_s29, 256, %s250_s3, [#allocation4], %s195_s10, %s195_s10, %s196_s11  }
 0x15f   :  { %189 = dma.done.wait [#allocation4], 256  }
 0x160   :  { %190 = vsyncadd [#allocation4], 4294967040 }
 0x161   :  { %127 = vsyncpa [#allocation3], 1 }
 0x162   :  { %128 = vsyncpa [#allocation4], 1 }

</bundles_post_ra>
